<compile_context>
chip_gen: v6e
topology: v6e:2x2x1
jax: 0.10.0
libtpu: 0.0.40
codegen_flags: <defaults>
</compile_context>

<pallas_src>
import jax
import jax.numpy as jnp
from jax.experimental import pallas as pl
from jax.experimental.pallas import tpu as pltpu


def _round_up(x, m):
    return ((x + m - 1) // m) * m


def _mlp_policy_kernel(s_ref, w1_ref, b1_ref, w2_ref, b2_ref, out_ref):
    """One batch tile: prob = softmax(relu(s @ W1 + b1) @ W2p + b2p)."""
    x = s_ref[...]                                  # (TB, S) f32
    w1 = w1_ref[...]                                # (S, H)  f32
    S = x.shape[1]

    # Layer 1. state_dim is tiny (3 for Pendulum), so a handful of broadcast
    # FMAs on the VPU beat a nearly-empty K=3 MXU pass. Bias folded into the
    # first FMA (saves one full (TB, H) add sweep).
    if S <= 8:
        h = x[:, 0:1] * w1[0:1, :] + b1_ref[...]
        for k in range(1, S):
            h = h + x[:, k:k + 1] * w1[k:k + 1, :]
    else:
        h = jnp.dot(x, w1, preferred_element_type=jnp.float32) + b1_ref[...]
    h = jnp.maximum(h, 0.0)                         # (TB, H), ReLU

    # Layer 2 on the MXU. w2/b2 arrive lane-padded to a multiple of 128; padded
    # lanes carry bias -1e30, so exp() underflows to 0 and softmax is exact.
    logits = jnp.dot(h, w2_ref[...], preferred_element_type=jnp.float32)
    logits = logits + b2_ref[...]                   # (TB, A_pad)

    # Numerically stable softmax with EXACT normalization (rows sum to 1 within
    # f32 rounding; approx reciprocal previously failed the sum-to-1 check).
    m = jnp.max(logits, axis=-1, keepdims=True)
    e = jnp.exp(logits - m)
    denom = jnp.sum(e, axis=-1, keepdims=True)
    out_ref[...] = (e / denom).astype(out_ref.dtype)


def prepare_params(w1, b1, w2, b2):
    """One-time parameter prep (dtype casts + lane padding of the output layer).

    Call once after (re)initializing or updating the policy weights and reuse
    the returned tuple on every policy step; this hoists the padded-weight
    construction (~0.5 MB of HBM writes) out of the rollout hot loop.
    """
    w1 = jnp.asarray(w1, jnp.float32)               # (S, H)
    H = w1.shape[1]
    A = jnp.asarray(w2).shape[1]
    A_pad = _round_up(A, 128)
    b1p = jnp.asarray(b1, jnp.float32).reshape(1, H)
    w2p = jnp.zeros((H, A_pad), jnp.float32).at[:, :A].set(
        jnp.asarray(w2, jnp.float32))
    b2p = jnp.full((1, A_pad), -1e30, jnp.float32).at[:, :A].set(
        jnp.asarray(b2, jnp.float32).reshape(1, A))
    return (w1, b1p, w2p, b2p, A)


def mlp_discrete_policy_prepped(s, prepped, *, max_tile_b=1024):
    """s: (B, state_dim) f32, prepped = prepare_params(...) -> prob: (B, action_dim)."""
    w1, b1, w2p, b2p, A = prepped
    B, S = s.shape
    H = w1.shape[1]
    A_pad = w2p.shape[1]

    # Batch tiling:
    #   * small/medium batches -> one full-batch tile (grid=(1,)): no padding
    #     beyond 8-row sublane alignment and no per-step pipeline overhead.
    #   * large batches -> an EVEN number of tiles (balanced across v7x's two
    #     TensorCores), each at most max_tile_b rows, with minimal padding.
    B8 = _round_up(max(B, 8), 8)
    if B8 <= max_tile_b:
        tile_b, n_tiles = B8, 1
    else:
        n_tiles = pl.cdiv(B8, max_tile_b)
        if n_tiles % 2:
            n_tiles += 1
        tile_b = _round_up(pl.cdiv(B8, n_tiles), 8)
    B_pad = tile_b * n_tiles

    s = s.astype(jnp.float32)
    if B_pad != B:
        s = jnp.pad(s, ((0, B_pad - B), (0, 0)))

    cost = pl.CostEstimate(
        flops=2 * B_pad * (S * H + H * A_pad),
        transcendentals=B_pad * A_pad,
        bytes_accessed=4 * (B_pad * S + S * H + H + H * A_pad + A_pad
                            + B_pad * A_pad),
    )

    # Footprint is a few MB at most; only raise the scoped-VMEM limit if a very
    # large tile would exceed v5e's 16 MiB default (never shrink tiles for it).
    est_vmem = 4 * (2 * tile_b * (S + A_pad) + S * H + H + H * A_pad + A_pad)
    vmem_limit = None
    if est_vmem > 14 * 1024 * 1024:
        vmem_limit = min(2 * est_vmem, 60 * 1024 * 1024)

    out = pl.pallas_call(
        _mlp_policy_kernel,
        out_shape=jax.ShapeDtypeStruct((B_pad, A_pad), jnp.float32),
        grid=(n_tiles,),
        in_specs=[
            pl.BlockSpec((tile_b, S), lambda i: (i, 0)),
            pl.BlockSpec((S, H), lambda i: (0, 0)),        # weights stay
            pl.BlockSpec((1, H), lambda i: (0, 0)),        # VMEM-resident
            pl.BlockSpec((H, A_pad), lambda i: (0, 0)),    # across grid steps
            pl.BlockSpec((1, A_pad), lambda i: (0, 0)),
        ],
        out_specs=pl.BlockSpec((tile_b, A_pad), lambda i: (i, 0)),
        compiler_params=pltpu.CompilerParams(
            dimension_semantics=("parallel",),             # v7x: both TCs
            vmem_limit_bytes=vmem_limit),
        cost_estimate=cost,
    )(s, w1, b1, w2p, b2p)

    return out[:B, :A]


def mlp_discrete_policy(s, w1, b1, w2, b2, *, max_tile_b=1024):
    """Convenience wrapper. Prefer prepare_params() once + *_prepped() per step."""
    return mlp_discrete_policy_prepped(s, prepare_params(w1, b1, w2, b2),
                                       max_tile_b=max_tile_b)


def init_params(key, state_dim, hidden_dim, action_dim):
    """Deterministic init mimicking nn.Linear default (uniform +/- 1/sqrt(fan_in))."""
    k1, k2, k3, k4 = jax.random.split(key, 4)
    bound1 = 1.0 / jnp.sqrt(state_dim)
    bound2 = 1.0 / jnp.sqrt(hidden_dim)
    w1 = jax.random.uniform(k1, (state_dim, hidden_dim), jnp.float32, -bound1, bound1)
    b1 = jax.random.uniform(k2, (1, hidden_dim), jnp.float32, -bound1, bound1)
    w2 = jax.random.uniform(k3, (hidden_dim, action_dim), jnp.float32, -bound2, bound2)
    b2 = jax.random.uniform(k4, (1, action_dim), jnp.float32, -bound2, bound2)
    return w1, b1, w2, b2


def _reference(s, w1, b1, w2, b2):
    h = jnp.maximum(s @ w1 + b1, 0.0)
    return jax.nn.softmax(h @ w2 + b2, axis=-1)


if __name__ == "__main__":
    # Pendulum-like dims (state_dim=3, discretized action_dim=5); small hidden
    # width keeps the example quick while exercising the real code paths.
    STATE_DIM, HIDDEN_DIM, ACTION_DIM = 3, 128, 5

    key = jax.random.PRNGKey(0)
    ks1, kp, ks2, ks3 = jax.random.split(key, 4)
    w1, b1, w2, b2 = init_params(kp, STATE_DIM, HIDDEN_DIM, ACTION_DIM)
    prepped = prepare_params(w1, b1, w2, b2)   # one-time weight padding

    # Case 1: medium batch -> single full-batch tile (grid=(1,)).
    B1 = 64
    s = jax.random.normal(ks1, (B1, STATE_DIM), jnp.float32)
    prob = jax.block_until_ready(mlp_discrete_policy_prepped(s, prepped))
    prob_ref = _reference(s, w1, b1, w2, b2)
    assert prob.shape == (B1, ACTION_DIM)
    assert jnp.allclose(prob, prob_ref, atol=1e-4), "batched mismatch vs reference"
    assert jnp.allclose(jnp.sum(prob, axis=-1), 1.0, atol=1e-5), "rows must sum to 1"

    # Case 2: tiny batch (exercises batch padding to 8 rows, single tile).
    s_small = jax.random.normal(ks2, (5, STATE_DIM), jnp.float32)
    prob_small = jax.block_until_ready(mlp_discrete_policy_prepped(s_small, prepped))
    prob_small_ref = _reference(s_small, w1, b1, w2, b2)
    assert prob_small.shape == (5, ACTION_DIM)
    assert jnp.allclose(prob_small, prob_small_ref, atol=1e-4), "small mismatch"
    assert jnp.allclose(jnp.sum(prob_small, axis=-1), 1.0, atol=1e-5)

    # Case 3: multi-tile path with an even tile count (160 rows, 4 x 40-row tiles).
    B3 = 160
    s_big = jax.random.normal(ks3, (B3, STATE_DIM), jnp.float32)
    prob_big = jax.block_until_ready(
        mlp_discrete_policy_prepped(s_big, prepped, max_tile_b=64))
    prob_big_ref = _reference(s_big, w1, b1, w2, b2)
    assert prob_big.shape == (B3, ACTION_DIM)
    assert jnp.allclose(prob_big, prob_big_ref, atol=1e-4), "multi-tile mismatch"
    assert jnp.allclose(jnp.sum(prob_big, axis=-1), 1.0, atol=1e-5)

    print("KERNEL_OK")
</pallas_src>

<mosaic_0001>
module attributes {stable_mosaic.version = 11 : i64} {
  func.func @_mlp_policy_kernel(%arg0: i32, %arg1: memref<64x3xf32, #tpu.memory_space<vmem>>, %arg2: memref<3x128xf32, #tpu.memory_space<vmem>>, %arg3: memref<1x128xf32, #tpu.memory_space<vmem>>, %arg4: memref<128x128xf32, #tpu.memory_space<vmem>>, %arg5: memref<1x128xf32, #tpu.memory_space<vmem>>, %arg6: memref<64x128xf32, #tpu.memory_space<vmem>>) attributes {dimension_semantics = [#tpu.dimension_semantics<parallel>], iteration_bounds = array<i64: 1>, scalar_prefetch = 0 : i64, scratch_operands = 0 : i64, tpu.core_type = #tpu.core_type<tc>, window_params = [{transform_indices = @transform_0, window_bounds = array<i64: 64, 3>}, {pipeline_mode = #tpu.pipeline_mode<synchronous>, transform_indices = @transform_1, window_bounds = array<i64: 3, 128>}, {pipeline_mode = #tpu.pipeline_mode<synchronous>, transform_indices = @transform_2, window_bounds = array<i64: 1, 128>}, {pipeline_mode = #tpu.pipeline_mode<synchronous>, transform_indices = @transform_3, window_bounds = array<i64: 128, 128>}, {pipeline_mode = #tpu.pipeline_mode<synchronous>, transform_indices = @transform_4, window_bounds = array<i64: 1, 128>}, {transform_indices = @transform_5, window_bounds = array<i64: 64, 128>}]} {
    %c0 = arith.constant 0 : index
    %c0_0 = arith.constant 0 : index
    %0 = vector.load %arg1[%c0, %c0_0] : memref<64x3xf32, #tpu.memory_space<vmem>>, vector<64x3xf32>
    %c0_1 = arith.constant 0 : index
    %c0_2 = arith.constant 0 : index
    %1 = vector.load %arg2[%c0_1, %c0_2] : memref<3x128xf32, #tpu.memory_space<vmem>>, vector<3x128xf32>
    %2 = vector.extract_strided_slice %0 {offsets = [0, 0], sizes = [64, 1], strides = [1, 1]} : vector<64x3xf32> to vector<64x1xf32>
    %3 = vector.extract_strided_slice %1 {offsets = [0, 0], sizes = [1, 128], strides = [1, 1]} : vector<3x128xf32> to vector<1x128xf32>
    %4 = vector.broadcast %2 : vector<64x1xf32> to vector<64x128xf32>
    %5 = vector.broadcast %3 : vector<1x128xf32> to vector<64x128xf32>
    %6 = arith.mulf %4, %5 : vector<64x128xf32>
    %c0_3 = arith.constant 0 : index
    %c0_4 = arith.constant 0 : index
    %7 = vector.load %arg3[%c0_3, %c0_4] : memref<1x128xf32, #tpu.memory_space<vmem>>, vector<1x128xf32>
    %8 = vector.broadcast %7 : vector<1x128xf32> to vector<64x128xf32>
    %9 = arith.addf %6, %8 : vector<64x128xf32>
    %10 = vector.extract_strided_slice %0 {offsets = [0, 1], sizes = [64, 1], strides = [1, 1]} : vector<64x3xf32> to vector<64x1xf32>
    %11 = vector.extract_strided_slice %1 {offsets = [1, 0], sizes = [1, 128], strides = [1, 1]} : vector<3x128xf32> to vector<1x128xf32>
    %12 = vector.broadcast %10 : vector<64x1xf32> to vector<64x128xf32>
    %13 = vector.broadcast %11 : vector<1x128xf32> to vector<64x128xf32>
    %14 = arith.mulf %12, %13 : vector<64x128xf32>
    %15 = arith.addf %9, %14 : vector<64x128xf32>
    %16 = vector.extract_strided_slice %0 {offsets = [0, 2], sizes = [64, 1], strides = [1, 1]} : vector<64x3xf32> to vector<64x1xf32>
    %17 = vector.extract_strided_slice %1 {offsets = [2, 0], sizes = [1, 128], strides = [1, 1]} : vector<3x128xf32> to vector<1x128xf32>
    %18 = vector.broadcast %16 : vector<64x1xf32> to vector<64x128xf32>
    %19 = vector.broadcast %17 : vector<1x128xf32> to vector<64x128xf32>
    %20 = arith.mulf %18, %19 : vector<64x128xf32>
    %21 = arith.addf %15, %20 : vector<64x128xf32>
    %cst = arith.constant 0.000000e+00 : f32
    %22 = vector.broadcast %cst : f32 to vector<64x128xf32>
    %23 = arith.maximumf %21, %22 : vector<64x128xf32>
    %c0_5 = arith.constant 0 : index
    %c0_6 = arith.constant 0 : index
    %24 = vector.load %arg4[%c0_5, %c0_6] : memref<128x128xf32, #tpu.memory_space<vmem>>, vector<128x128xf32>
    %cst_7 = arith.constant dense<0.000000e+00> : vector<64x128xf32>
    %25 = tpu.matmul %23, %24, %cst_7 {dimension_numbers = #tpu.dot_dimension_numbers<[1], [0], [0], [1], [0, 0, 1, 1], [], []>} : vector<64x128xf32>, vector<128x128xf32>, vector<64x128xf32> -> vector<64x128xf32>
    %c0_8 = arith.constant 0 : index
    %c0_9 = arith.constant 0 : index
    %26 = vector.load %arg5[%c0_8, %c0_9] : memref<1x128xf32, #tpu.memory_space<vmem>>, vector<1x128xf32>
    %27 = vector.broadcast %26 : vector<1x128xf32> to vector<64x128xf32>
    %28 = arith.addf %25, %27 : vector<64x128xf32>
    %cst_10 = arith.constant dense<0xFF800000> : vector<64xf32>
    %29 = vector.multi_reduction <maximumf>, %28, %cst_10 [1] : vector<64x128xf32> to vector<64xf32>
    %30 = vector.shape_cast %29 : vector<64xf32> to vector<64x1xf32>
    %31 = vector.broadcast %30 : vector<64x1xf32> to vector<64x128xf32>
    %32 = arith.subf %28, %31 : vector<64x128xf32>
    %33 = math.exp %32 : vector<64x128xf32>
    %cst_11 = arith.constant dense<0.000000e+00> : vector<64xf32>
    %34 = vector.multi_reduction <add>, %33, %cst_11 [1] : vector<64x128xf32> to vector<64xf32>
    %35 = vector.shape_cast %34 : vector<64xf32> to vector<64x1xf32>
    %36 = vector.broadcast %35 : vector<64x1xf32> to vector<64x128xf32>
    %37 = arith.divf %33, %36 : vector<64x128xf32>
    %c0_12 = arith.constant 0 : index
    %c0_13 = arith.constant 0 : index
    %38 = vector.load %arg6[%c0_12, %c0_13] : memref<64x128xf32, #tpu.memory_space<vmem>>, vector<64x128xf32>
    tpu.vector_store %arg6[%c0_12, %c0_13], %37 {strides = array<i32>} : memref<64x128xf32, #tpu.memory_space<vmem>>, vector<64x128xf32>,
    return
  }
  func.func @transform_0(%arg0: i32) -> (i32, i32) {
    %c0_i32 = arith.constant 0 : i32
    %c0_i32_0 = arith.constant 0 : i32
    return %arg0, %c0_i32 : i32, i32
  }
  func.func @transform_1(%arg0: i32) -> (i32, i32) {
    %c0_i32 = arith.constant 0 : i32
    %c0_i32_0 = arith.constant 0 : i32
    %c0_i32_1 = arith.constant 0 : i32
    return %c0_i32, %c0_i32_0 : i32, i32
  }
  func.func @transform_2(%arg0: i32) -> (i32, i32) {
    %c0_i32 = arith.constant 0 : i32
    %c0_i32_0 = arith.constant 0 : i32
    %c0_i32_1 = arith.constant 0 : i32
    return %c0_i32, %c0_i32_0 : i32, i32
  }
  func.func @transform_3(%arg0: i32) -> (i32, i32) {
    %c0_i32 = arith.constant 0 : i32
    %c0_i32_0 = arith.constant 0 : i32
    %c0_i32_1 = arith.constant 0 : i32
    return %c0_i32, %c0_i32_0 : i32, i32
  }
  func.func @transform_4(%arg0: i32) -> (i32, i32) {
    %c0_i32 = arith.constant 0 : i32
    %c0_i32_0 = arith.constant 0 : i32
    %c0_i32_1 = arith.constant 0 : i32
    return %c0_i32, %c0_i32_0 : i32, i32
  }
  func.func @transform_5(%arg0: i32) -> (i32, i32) {
    %c0_i32 = arith.constant 0 : i32
    %c0_i32_0 = arith.constant 0 : i32
    return %arg0, %c0_i32 : i32, i32
  }
}

</mosaic_0001>

<bundles_post_ra>
// kernel: tpu_custom_call.1
= control target key start
LH: loop header
LB: loop body
LE: loop exit
PB: predicated region body
PF: predicated region fallthrough
CT: control target
= control target key end

     0   :  { %10 = vsyncpa [#allocation3], 0  ;;  %s809_s0 = inlined_call_operand.vmem [shape: f32[64,3], index: 0, kind: input, shape index: {}]   ;;  %s810_s1 = inlined_call_operand.vmem [shape: f32[3,128], index: 1, kind: input, shape index: {}]   ;;  %s811_s2 = inlined_call_operand.vmem [shape: f32[1,128], index: 2, kind: input, shape index: {}]   ;;  %s812_s3 = inlined_call_operand.hbm [shape: f32[128,128], index: 3, kind: input, shape index: {}]   ;;  %s813_s4 = inlined_call_operand.vmem [shape: f32[1,128], index: 4, kind: input, shape index: {}]   ;;  %s814_s5 = inlined_call_operand.hbm [shape: f32[64,128], index: 5, kind: output, shape index: {}]  }
   0x1   :  { %11 = vsyncpa [#allocation4], 0  ;;  %s644_s18 = smov [#allocation2]  }
   0x2   :  { %s23_s19 = sshll.u32 %s644_s18, 4  ;;  %s24_s19 = int_to_ptr.vmem [resolvable:$true] %s23_s19 }
   0x3   :  { %s608_s20 = scalar_lea.vmem %s24_s19, 2048  ;;  %p613_p1 = scmp.lt.s32.totalorder %s24_s19, %s24_s19 }
   0x4   :  { %p609_p0 = scmp.ne.s32.totalorder %s24_s19, %s608_s20  ;;  %p614_p2 = scmp.lt.s32.totalorder %s608_s20, %s608_s20 }
   0x6   :  { %p615_p3 = por %p614_p2, %p613_p1 }
   0x8   :  { %p616_p4 = pnand %p615_p3, %p609_p0 }
   0xa   :  { %619 = shalt.err (!%p616_p4)
}
   0xb   :  { %s645_s21 = smov 128   ;;  %s646_s22 = smov 8  }
   0xc   :  { %29 = dma.hbm_to_vmem [thread:$0]  %s812_s3, 2048, %s24_s19, [#allocation3], %s645_s21, %s645_s21, %s646_s22  }
   0xd   :  { %640 = dma.done.wait [#allocation3], 2048  }
   0xe   :  { %641 = vsyncadd [#allocation3], 4294965248  ;;  %v647_v0 = vmov 0   ;;  %v692_v1 = vld [vmem:[%s809_s0 + $0x8] sm:$0xff]  ;;  %v35_v2 = vld [vmem:[%s809_s0] sm:$0xff]  ;;  %v648_v9 = vmov 1   ;;  %v84_v27 = vlaneseq }
   0xf   :  { %558 = vset.pattern.permute.xlu1 %v647_v0  ;;  %557 = vset.pattern.permute.xlu0 %v647_v0  ;;  %v701_v3 = vld [vmem:[%s809_s0 + $0x28] sm:$0xff]  ;;  %v706_v4 = vld [vmem:[%s809_s0 + $0x20] sm:$0xff]  ;;  %v238_v5 = vld [vmem:[#allocation2 + $0x78] sm:$0xff]  ;;  %v649_v18 = vmov 2  }
  0x10   :  { %51 = vperm.xlu1 %558, %v692_v1   ;;  %46 = vperm.xlu0 %557, %v35_v2   ;;  %v237_v6 = vld [vmem:[#allocation2 + $0x70] sm:$0xff]  ;;  %v236_v8 = vld [vmem:[#allocation2 + $0x68] sm:$0xff]  ;;  %v235_v10 = vld [vmem:[#allocation2 + $0x60] sm:$0xff]  ;;  %v85_v30 = vshrl.u32 %v84_v27, 7 }
  0x11   :  { %474 = vmatprep.subr.mxu0 %v238_v5  ;;  %518 = vmatprep.subr.mxu1 %v238_v5  ;;  %v713_v7 = vld [vmem:[%s809_s0 + $0x30] sm:$0xff]  ;;  %v721_v11 = vld [vmem:[%s809_s0 + $0x18] sm:$0xff]  ;;  %v232_v15 = vld [vmem:[#allocation2 + $0x48] sm:$0xff] }
  0x12   :  { %475 = vmatpush3.msra.mxu0 %v238_v5  ;;  %534 = vmatpush3.msra.mxu1 %v238_v5  ;;  %v234_v12 = vld [vmem:[#allocation2 + $0x58] sm:$0xff]  ;;  %v233_v13 = vld [vmem:[#allocation2 + $0x50] sm:$0xff]  ;;  %v231_v16 = vld [vmem:[#allocation2 + $0x40] sm:$0xff]  ;;  %v86_v33 = vsub.s32 0, %v85_v30  ;;  %v145_v38 = vsub.s32 1, %v85_v30  ;;  %v197_v43 = vsub.s32 2, %v85_v30 }
  0x13   :  { %476 = vmatprep.subr.mxu0 %v237_v6  ;;  %519 = vmatprep.subr.mxu1 %v237_v6  ;;  %v728_v14 = vld [vmem:[%s809_s0 + $0x10] sm:$0xff]  ;;  %v230_v17 = vld [vmem:[#allocation2 + $0x38] sm:$0xff]  ;;  %v228_v20 = vld [vmem:[#allocation2 + $0x28] sm:$0xff] }
  0x14   :  { %71 = vperm.xlu1 %558, %v701_v3   ;;  %66 = vperm.xlu0 %557, %v706_v4   ;;  %v229_v19 = vld [vmem:[#allocation2 + $0x30] sm:$0xff]  ;;  %v227_v21 = vld [vmem:[#allocation2 + $0x20] sm:$0xff]  ;;  %v42_v22 = vld [vmem:[%s809_s0 + $0x38] sm:$0xff] }
  0x15   :  { %477 = vmatpush3.msra.mxu0 %v237_v6  ;;  %535 = vmatpush3.msra.mxu1 %v237_v6  ;;  %v226_v23 = vld [vmem:[#allocation2 + $0x18] sm:$0xff]  ;;  %v225_v24 = vld [vmem:[#allocation2 + $0x10] sm:$0xff]  ;;  %v224_v25 = vld [vmem:[#allocation2 + $0x8] sm:$0xff] }
  0x16   :  { %478 = vmatprep.subr.mxu0 %v236_v8  ;;  %520 = vmatprep.subr.mxu1 %v236_v8  ;;  %v223_v26 = vld [vmem:[#allocation2] sm:$0xff] }
  0x17   :  { %479 = vmatpush3.msra.mxu0 %v236_v8  ;;  %536 = vmatpush3.msra.mxu1 %v236_v8  ;;  %v43_v35 = vld [vmem:[%s810_s1] sm:$0x7] }
  0x18   :  { %559 = vset.pattern.permute.xlu1 %v648_v9  ;;  %76 = vperm.xlu0 %557, %v713_v7   ;;  %v753_v37 = vrot.slane %v43_v35, %v86_v33  ;;  %v758_v42 = vrot.slane %v43_v35, %v145_v38  ;;  %v763_v44 = vld [vmem:[%s811_s2] ss:$0 sm:$0xff]  ;;  %v768_v50 = vrot.slane %v43_v35, %v197_v43 }
  0x19   :  { %128 = vperm.xlu1 %559, %v706_v4   ;;  %480 = vmatprep.subr.mxu0 %v235_v10 }
  0x1a   :  { %481 = vmatpush3.msra.mxu0 %v235_v10  ;;  %521 = vmatprep.subr.mxu1 %v235_v10 }
  0x1b   :  { %482 = vmatprep.subr.mxu0 %v234_v12  ;;  %537 = vmatpush3.msra.mxu1 %v235_v10 }
  0x1c   :  { %61 = vperm.xlu0 %557, %v721_v11   ;;  %483 = vmatpush3.msra.mxu0 %v234_v12 }
  0x1d   :  { %116 = vperm.xlu1 %559, %v692_v1   ;;  %484 = vmatprep.subr.mxu0 %v233_v13 }
  0x1e   :  { %485 = vmatpush3.msra.mxu0 %v233_v13  ;;  %522 = vmatprep.subr.mxu1 %v234_v12 }
  0x1f   :  { %486 = vmatprep.subr.mxu0 %v232_v15  ;;  %538 = vmatpush3.msra.mxu1 %v234_v12 }
  0x20   :  { %562 = vset.pattern.permute.xlu0 %v648_v9  ;;  %487 = vmatpush3.msra.mxu0 %v232_v15 }
  0x21   :  { %560 = vset.pattern.permute.xlu1 %v647_v0  ;;  %112 = vperm.xlu0 %562, %v35_v2  }
  0x22   :  { %56 = vperm.xlu1 %560, %v728_v14   ;;  %488 = vmatprep.subr.mxu0 %v231_v16 }
  0x23   :  { %489 = vmatpush3.msra.mxu0 %v231_v16  ;;  %523 = vmatprep.subr.mxu1 %v233_v13 }
  0x24   :  { %490 = vmatprep.subr.mxu0 %v230_v17  ;;  %539 = vmatpush3.msra.mxu1 %v233_v13 }
  0x25   :  { %132 = vperm.xlu0 %562, %v701_v3   ;;  %491 = vmatpush3.msra.mxu0 %v230_v17 }
  0x26   :  { %561 = vset.pattern.permute.xlu1 %v649_v18  ;;  %492 = vmatprep.subr.mxu0 %v229_v19 }
  0x27   :  { %164 = vperm.xlu1 %561, %v35_v2   ;;  %524 = vmatprep.subr.mxu1 %v232_v15 }
  0x28   :  { %493 = vmatpush3.msra.mxu0 %v229_v19  ;;  %540 = vmatpush3.msra.mxu1 %v232_v15 }
  0x29   :  { %136 = vperm.xlu0 %562, %v713_v7   ;;  %494 = vmatprep.subr.mxu0 %v228_v20 }
  0x2a   :  { %525 = vmatprep.subr.mxu1 %v231_v16  ;;  %495 = vmatpush3.msra.mxu0 %v228_v20 }
  0x2b   :  { %180 = vperm.xlu1 %561, %v706_v4   ;;  %541 = vmatpush3.msra.mxu1 %v231_v16 }
  0x2c   :  { %496 = vmatprep.subr.mxu0 %v227_v21  ;;  %526 = vmatprep.subr.mxu1 %v230_v17 }
  0x2d   :  { %566 = vset.pattern.permute.xlu0 %v649_v18  ;;  %497 = vmatpush3.msra.mxu0 %v227_v21 }
  0x2e   :  { %168 = vperm.xlu0 %566, %v692_v1   ;;  %542 = vmatpush3.msra.mxu1 %v230_v17 }
  0x2f   :  { %563 = vset.pattern.permute.xlu1 %v647_v0  ;;  %498 = vmatprep.subr.mxu0 %v226_v23 }
  0x30   :  { %81 = vperm.xlu1 %563, %v42_v22   ;;  %527 = vmatprep.subr.mxu1 %v229_v19 }
  0x31   :  { %499 = vmatpush3.msra.mxu0 %v226_v23  ;;  %543 = vmatpush3.msra.mxu1 %v229_v19 }
  0x32   :  { %172 = vperm.xlu0 %566, %v728_v14   ;;  %500 = vmatprep.subr.mxu0 %v225_v24 }
  0x33   :  { %528 = vmatprep.subr.mxu1 %v228_v20  ;;  %501 = vmatpush3.msra.mxu0 %v225_v24 }
  0x34   :  { %564 = vset.pattern.permute.xlu1 %v649_v18  ;;  %544 = vmatpush3.msra.mxu1 %v228_v20 }
  0x35   :  { %184 = vperm.xlu1 %564, %v701_v3   ;;  %502 = vmatprep.subr.mxu0 %v224_v25 }
  0x36   :  { %192 = vperm.xlu0 %566, %v42_v22   ;;  %529 = vmatprep.subr.mxu1 %v227_v21 }
  0x37   :  { %503 = vmatpush3.msra.mxu0 %v224_v25  ;;  %545 = vmatpush3.msra.mxu1 %v227_v21 }
  0x38   :  { %504 = vmatprep.subr.mxu0 %v223_v26  ;;  %530 = vmatprep.subr.mxu1 %v226_v23 }
  0x39   :  { %565 = vset.pattern.permute.xlu1 %v648_v9  ;;  %505 = vmatpush3.msra.mxu0 %v223_v26 }
  0x3a   :  { %120 = vperm.xlu1 %565, %v728_v14   ;;  %546 = vmatpush3.msra.mxu1 %v226_v23 }
  0x3b   :  { %531 = vmatprep.subr.mxu1 %v225_v24 }
  0x3c   :  { %547 = vmatpush3.msra.mxu1 %v225_v24 }
  0x3d   :  { %532 = vmatprep.subr.mxu1 %v224_v25 }
  0x3e   :  { %124 = vperm.xlu1 %565, %v721_v11   ;;  %548 = vmatpush3.msra.mxu1 %v224_v25 }
  0x3f   :  { %533 = vmatprep.subr.mxu1 %v223_v26 }
  0x40   :  { %549 = vmatpush3.msra.mxu1 %v223_v26 }
  0x42   :  { %140 = vperm.xlu1 %565, %v42_v22  }
  0x46   :  { %567 = vset.pattern.permute.xlu1 %v649_v18 }
  0x47   :  { %188 = vperm.xlu1 %567, %v713_v7  }
  0x4b   :  { %176 = vperm.xlu1 %567, %v721_v11  }
  0x8b   :  { %v52_v28 = vpop.permute.xlu1 %51  ;;  %v47_v29 = vpop.permute.xlu0 %46 }
  0x8c   :  { %v88_v41 = vmul.f32 %v753_v37, %v47_v29  ;;  %v89_v57 = vmul.f32 %v753_v37, %v52_v28 }
  0x8e   :  { %v103_v46 = vadd.f32 %v763_v44, %v88_v41  ;;  %v104_v1 = vadd.f32 %v763_v44, %v89_v57 }
  0x8f   :  { %v72_v31 = vpop.permute.xlu1 %71  ;;  %v67_v32 = vpop.permute.xlu0 %66 }
  0x90   :  { %v92_v49 = vmul.f32 %v753_v37, %v67_v32  ;;  %v93_v6 = vmul.f32 %v753_v37, %v72_v31 }
  0x92   :  { %v107_v54 = vadd.f32 %v763_v44, %v92_v49  ;;  %v108_v12 = vadd.f32 %v763_v44, %v93_v6 }
  0x93   :  { %v748_v34 = vpop.permute.xlu0 %76 }
  0x94   :  { %v129_v36 = vpop.permute.xlu1 %128  ;;  %v94_v29 = vmul.f32 %v753_v37, %v748_v34 }
  0x95   :  { %v151_v55 = vmul.f32 %v758_v42, %v129_v36 }
  0x97   :  { %v755_v39 = vpop.permute.xlu0 %61  ;;  %v159_v0 = vadd.f32 %v151_v55, %v107_v54 }
  0x98   :  { %v117_v40 = vpop.permute.xlu1 %116  ;;  %v91_v41 = vmul.f32 %v753_v37, %v755_v39  ;;  %v449_v39 = vld [vmem:[%s813_s4] ss:$0 sm:$0xff]  ;;  %s650_s4 = smov [#allocation5]  }
  0x99   :  { %v148_v60 = vmul.f32 %v758_v42, %v117_v40  ;;  %v109_v40 = vadd.f32 %v763_v44, %v94_v29  ;;  %s436_s18 = sshll.u32 %s650_s4, 4  ;;  %s437_s18 = int_to_ptr.vmem [resolvable:$true] %s436_s18 }
  0x9a   :  { %s620_s19 = scalar_lea.vmem %s437_s18, 1024  ;;  %p625_p6 = scmp.lt.s32.totalorder %s437_s18, %s437_s18 }
  0x9b   :  { %v156_v4 = vadd.f32 %v148_v60, %v104_v1  ;;  %p621_p5 = scmp.ne.s32.totalorder %s437_s18, %s620_s19  ;;  %p626_p7 = scmp.lt.s32.totalorder %s620_s19, %s620_s19 }
  0x9c   :  { %v113_v45 = vpop.permute.xlu0 %112 }
  0x9d   :  { %v147_v47 = vmul.f32 %v758_v42, %v113_v45  ;;  %v57_v48 = vpop.permute.xlu1 %56  ;;  %p627_p8 = por %p626_p7, %p625_p6 }
  0x9e   :  { %v90_v16 = vmul.f32 %v753_v37, %v57_v48  ;;  %v106_v48 = vadd.f32 %v763_v44, %v91_v41 }
  0x9f   :  { %v155_v52 = vadd.f32 %v147_v47, %v103_v46  ;;  %p628_p9 = pnand %p627_p8, %p621_p5 }
  0xa0   :  { %v133_v51 = vpop.permute.xlu0 %132  ;;  %v105_v21 = vadd.f32 %v763_v44, %v90_v16 }
  0xa1   :  { %v152_v10 = vmul.f32 %v758_v42, %v133_v51 }
  0xa2   :  { %v165_v53 = vpop.permute.xlu1 %164 }
  0xa3   :  { %v199_v56 = vmul.f32 %v768_v50, %v165_v53  ;;  %v160_v14 = vadd.f32 %v152_v10, %v108_v12 }
  0xa4   :  { %v137_v58 = vpop.permute.xlu0 %136 }
  0xa5   :  { %v207_v59 = vadd.f32 %v199_v56, %v155_v52  ;;  %v153_v35 = vmul.f32 %v758_v42, %v137_v58 }
  0xa6   :  { %v181_v61 = vpop.permute.xlu1 %180 }
  0xa7   :  { %v203_v62 = vmul.f32 %v768_v50, %v181_v61  ;;  %v215_v63 = vmax.f32 %v207_v59, 0.0  ;;  %v161_v45 = vadd.f32 %v153_v35, %v109_v40 }
  0xa9   :  { %506 = vmatprep.mubr.f32.mxu0 %v215_v63  ;;  %v169_v2 = vpop.permute.xlu0 %168  ;;  %v211_v3 = vadd.f32 %v203_v62, %v159_v0 }
  0xaa   :  { %v200_v5 = vmul.f32 %v768_v50, %v169_v2 }
  0xab   :  { %v82_v7 = vpop.permute.xlu1 %81  ;;  %v219_v8 = vmax.f32 %v211_v3, 0.0 }
  0xac   :  { %v208_v9 = vadd.f32 %v200_v5, %v156_v4  ;;  %v95_v26 = vmul.f32 %v753_v37, %v82_v7 }
  0xad   :  { %512 = vmatprep.mubr.f32.mxu1 %v219_v8  ;;  %v173_v18 = vpop.permute.xlu0 %172 }
  0xae   :  { %v216_v11 = vmax.f32 %v208_v9, 0.0  ;;  %v201_v23 = vmul.f32 %v768_v50, %v173_v18  ;;  %v110_v32 = vadd.f32 %v763_v44, %v95_v26 }
  0xb0   :  { %v185_v13 = vpop.permute.xlu1 %184  ;;  %507 = vmatmul.mubr.f32.vlgmr.msra.gmra.mxu0 %v216_v11 }
  0xb1   :  { %v204_v15 = vmul.f32 %v768_v50, %v185_v13  ;;  %v193_v31 = vpop.permute.xlu0 %192 }
  0xb2   :  { %v206_v38 = vmul.f32 %v768_v50, %v193_v31 }
  0xb3   :  { %v212_v17 = vadd.f32 %v204_v15, %v160_v14 }
  0xb5   :  { %v220_v19 = vmax.f32 %v212_v17, 0.0  ;;  %v121_v20 = vpop.permute.xlu1 %120 }
  0xb6   :  { %v149_v22 = vmul.f32 %v758_v42, %v121_v20 }
  0xb7   :  { %513 = vmatmul.mubr.f32.vlgmr.msra.gmra.mxu1 %v220_v19 }
  0xb8   :  { %v157_v24 = vadd.f32 %v149_v22, %v105_v21 }
  0xb9   :  { %v125_v25 = vpop.permute.xlu1 %124 }
  0xba   :  { %v209_v27 = vadd.f32 %v201_v23, %v157_v24  ;;  %v150_v34 = vmul.f32 %v758_v42, %v125_v25 }
  0xbc   :  { %v217_v28 = vmax.f32 %v209_v27, 0.0  ;;  %v158_v52 = vadd.f32 %v150_v34, %v106_v48 }
  0xbd   :  { %v141_v30 = vpop.permute.xlu1 %140 }
  0xbe   :  { %v154_v33 = vmul.f32 %v758_v42, %v141_v30  ;;  %509 = vmatprep.mubr.f32.mxu0 %v217_v28 }
  0xc0   :  { %v162_v36 = vadd.f32 %v154_v33, %v110_v32 }
  0xc2   :  { %v189_v43 = vpop.permute.xlu1 %188  ;;  %v214_v47 = vadd.f32 %v206_v38, %v162_v36 }
  0xc3   :  { %v205_v46 = vmul.f32 %v768_v50, %v189_v43 }
  0xc4   :  { %v222_v55 = vmax.f32 %v214_v47, 0.0 }
  0xc5   :  { %v213_v49 = vadd.f32 %v205_v46, %v161_v45 }
  0xc6   :  { %v177_v51 = vpop.permute.xlu1 %176 }
  0xc7   :  { %v221_v53 = vmax.f32 %v213_v49, 0.0  ;;  %v202_v54 = vmul.f32 %v768_v50, %v177_v51 }
  0xc9   :  { %v210_v56 = vadd.f32 %v202_v54, %v158_v52  ;;  %515 = vmatprep.mubr.f32.mxu1 %v221_v53 }
  0xca   :  { %516 = vmatmul.mubr.f32.gmra.mxu1 %v222_v55 }
  0xcb   :  { %v218_v37 = vmax.f32 %v210_v56, 0.0 }
  0xcd   :  { %510 = vmatmul.mubr.f32.gmra.mxu0 %v218_v37 }
 0x170   :  { %v508_v42 = vpop.f32.mrf.mxu0 }
 0x171   :  { %v318_v57 = vadd.f32 %v508_v42, %v449_v39 }
 0x172   :  { %v312_v59 = vpop.f32.mrf.mxu0 }
 0x173   :  { %353 = vmax.xlane.f32.xlu0 %v318_v57  ;;  %v313_v50 = vadd.f32 %v449_v39, %v312_v59 }
 0x177   :  { %v514_v44 = vpop.f32.mrf.mxu1 }
 0x178   :  { %v338_v58 = vadd.f32 %v514_v44, %v449_v39 }
 0x179   :  { %v332_v60 = vpop.f32.mrf.mxu1 }
 0x17a   :  { %v333_v61 = vadd.f32 %v449_v39, %v332_v60  ;;  %361 = vmax.xlane.f32.xlu1 %v338_v58 }
 0x17c   :  { %359 = vmax.xlane.f32.xlu0 %v333_v61 }
 0x17e   :  { %351 = vmax.xlane.f32.xlu1 %v313_v50 }
 0x18a   :  { %v517_v62 = vpop.f32.mrf.mxu1 }
 0x18b   :  { %v348_v4 = vadd.f32 %v517_v62, %v449_v39 }
 0x18c   :  { %v342_v3 = vpop.f32.mrf.mxu1 }
 0x18d   :  { %v511_v63 = vpop.f32.mrf.mxu0  ;;  %v343_v5 = vadd.f32 %v449_v39, %v342_v3 }
 0x18e   :  { %v328_v0 = vadd.f32 %v511_v63, %v449_v39 }
 0x18f   :  { %v322_v1 = vpop.f32.mrf.mxu0 }
 0x190   :  { %v323_v2 = vadd.f32 %v449_v39, %v322_v1  ;;  %357 = vmax.xlane.f32.xlu1 %v328_v0 }
 0x192   :  { %355 = vmax.xlane.f32.xlu0 %v323_v2 }
 0x194   :  { %365 = vmax.xlane.f32.xlu1 %v348_v4 }
 0x196   :  { %363 = vmax.xlane.f32.xlu0 %v343_v5 }
 0x1fc   :  { %v354_v6 = vpop.xlane.xlu0 %353 }
 0x1fd   :  { %v368_v7 = vsub.f32 %v318_v57, %v354_v6 }
 0x1ff   :  { %v377_v8 = vmul.f32 1.442695, %v368_v7 }
 0x201   :  { %568 = vpow2.f32 %v377_v8 }
 0x203   :  { %v362_v9 = vpop.xlane.xlu1 %361 }
 0x204   :  { %v372_v10 = vsub.f32 %v338_v58, %v362_v9 }
 0x205   :  { %v360_v11 = vpop.xlane.xlu0 %359 }
 0x206   :  { %v385_v12 = vmul.f32 1.442695, %v372_v10  ;;  %v371_v14 = vsub.f32 %v333_v61, %v360_v11 }
 0x207   :  { %v352_v13 = vpop.xlane.xlu1 %351 }
 0x208   :  { %570 = vpow2.f32 %v385_v12  ;;  %v367_v15 = vsub.f32 %v313_v50, %v352_v13  ;;  %v383_v17 = vmul.f32 1.442695, %v371_v14 }
 0x20a   :  { %v375_v16 = vmul.f32 1.442695, %v367_v15 }
 0x20c   :  { %572 = vpow2.f32 %v375_v16 }
 0x20d   :  { %574 = vpow2.f32 %v383_v17 }
 0x20e   :  { %v569_v18 = vpop.eup %568 }
 0x20f   :  { %393 = vadd.xlane.f32.xlu1 %v569_v18 }
 0x215   :  { %v571_v19 = vpop.eup %570 }
 0x216   :  { %401 = vadd.xlane.f32.xlu1 %v571_v19 }
 0x219   :  { %v573_v20 = vpop.eup %572  ;;  %v358_v21 = vpop.xlane.xlu1 %357 }
 0x21a   :  { %v370_v22 = vsub.f32 %v328_v0, %v358_v21  ;;  %391 = vadd.xlane.f32.xlu0 %v573_v20  ;;  %v575_v26 = vpop.eup %574 }
 0x21b   :  { %v356_v23 = vpop.xlane.xlu0 %355 }
 0x21c   :  { %v381_v24 = vmul.f32 1.442695, %v370_v22  ;;  %v369_v25 = vsub.f32 %v323_v2, %v356_v23 }
 0x21d   :  { %v366_v27 = vpop.xlane.xlu1 %365 }
 0x21e   :  { %576 = vpow2.f32 %v381_v24  ;;  %v379_v28 = vmul.f32 1.442695, %v369_v25  ;;  %v374_v29 = vsub.f32 %v348_v4, %v366_v27  ;;  %399 = vadd.xlane.f32.xlu0 %v575_v26 }
 0x21f   :  { %v364_v30 = vpop.xlane.xlu0 %363 }
 0x220   :  { %578 = vpow2.f32 %v379_v28  ;;  %v389_v31 = vmul.f32 1.442695, %v374_v29  ;;  %v373_v32 = vsub.f32 %v343_v5, %v364_v30 }
 0x222   :  { %580 = vpow2.f32 %v389_v31  ;;  %v387_v33 = vmul.f32 1.442695, %v373_v32 }
 0x224   :  { %582 = vpow2.f32 %v387_v33 }
 0x22b   :  { %v577_v35 = vpop.eup %576 }
 0x22c   :  { %397 = vadd.xlane.f32.xlu1 %v577_v35 }
 0x22d   :  { %v579_v36 = vpop.eup %578 }
 0x22e   :  { %395 = vadd.xlane.f32.xlu0 %v579_v36 }
 0x22f   :  { %v581_v38 = vpop.eup %580 }
 0x230   :  { %405 = vadd.xlane.f32.xlu1 %v581_v38 }
 0x231   :  { %v583_v40 = vpop.eup %582 }
 0x232   :  { %403 = vadd.xlane.f32.xlu0 %v583_v40 }
 0x298   :  { %v394_v41 = vpop.xlane.xlu1 %393 }
 0x299   :  { %584 = vrcp.f32 %v394_v41 }
 0x29f   :  { %v402_v43 = vpop.xlane.xlu1 %401 }
 0x2a0   :  { %586 = vrcp.f32 %v402_v43 }
 0x2a3   :  { %v392_v45 = vpop.xlane.xlu0 %391 }
 0x2a4   :  { %588 = vrcp.f32 %v392_v45 }
 0x2a6   :  { %v585_v34 = vpop.eup %584 }
 0x2a7   :  { %v410_v46 = vmul.f32 %v585_v34, %v569_v18  ;;  %v400_v47 = vpop.xlane.xlu0 %399 }
 0x2a8   :  { %590 = vrcp.f32 %v400_v47 }
 0x2a9   :  { %424 = vst [vmem:[#allocation5 + $0x8] sm:$0xff] %v410_v46 }
 0x2ad   :  { %v587_v48 = vpop.eup %586 }
 0x2ae   :  { %v418_v49 = vmul.f32 %v587_v48, %v571_v19 }
 0x2b0   :  { %428 = vst [vmem:[#allocation5 + $0x28] sm:$0xff] %v418_v49 }
 0x2b1   :  { %v589_v51 = vpop.eup %588 }
 0x2b2   :  { %v408_v52 = vmul.f32 %v589_v51, %v573_v20 }
 0x2b4   :  { %423 = vst [vmem:[#allocation5] sm:$0xff] %v408_v52 }
 0x2b5   :  { %v591_v53 = vpop.eup %590  ;;  %v398_v54 = vpop.xlane.xlu1 %397 }
 0x2b6   :  { %v416_v55 = vmul.f32 %v591_v53, %v575_v26  ;;  %592 = vrcp.f32 %v398_v54 }
 0x2b7   :  { %v396_v56 = vpop.xlane.xlu0 %395 }
 0x2b8   :  { %427 = vst [vmem:[#allocation5 + $0x20] sm:$0xff] %v416_v55  ;;  %594 = vrcp.f32 %v396_v56 }
 0x2b9   :  { %v406_v37 = vpop.xlane.xlu1 %405 }
 0x2ba   :  { %596 = vrcp.f32 %v406_v37 }
 0x2bb   :  { %v404_v39 = vpop.xlane.xlu0 %403 }
 0x2bc   :  { %598 = vrcp.f32 %v404_v39 }
 0x2c3   :  { %v593_v42 = vpop.eup %592 }
 0x2c4   :  { %v414_v57 = vmul.f32 %v593_v42, %v577_v35 }
 0x2c5   :  { %v595_v44 = vpop.eup %594 }
 0x2c6   :  { %426 = vst [vmem:[#allocation5 + $0x18] sm:$0xff] %v414_v57  ;;  %v412_v58 = vmul.f32 %v595_v44, %v579_v36 }
 0x2c7   :  { %v597_v59 = vpop.eup %596 }
 0x2c8   :  { %425 = vst [vmem:[#allocation5 + $0x10] sm:$0xff] %v412_v58  ;;  %v422_v60 = vmul.f32 %v597_v59, %v581_v38 }
 0x2c9   :  { %v599_v61 = vpop.eup %598 }
 0x2ca   :  { %430 = vst [vmem:[#allocation5 + $0x38] sm:$0xff] %v422_v60  ;;  %v420_v50 = vmul.f32 %v599_v61, %v583_v40 }
 0x2cc   :  { %429 = vst [vmem:[#allocation5 + $0x30] sm:$0xff] %v420_v50 }
 0x2cd   :  { %631 = shalt.err (!%p628_p9)
}
 0x2ce   :  { %442 = dma.vmem_to_hbm [thread:$0]  %s437_s18, 1024, %s814_s5, [#allocation4], %s645_s21, %s645_s21, %s646_s22  }
 0x2cf   :  { %642 = dma.done.wait [#allocation4], 1024  }
 0x2d0   :  { %643 = vsyncadd [#allocation4], 4294966272 }
 0x2d1   :  { %446 = vsyncpa [#allocation3], 1 }
 0x2d2   :  { %447 = vsyncpa [#allocation4], 1 }

</bundles_post_ra>
